<compile_context>
chip_gen: v5e
topology: v5e:2x2
jax: 0.10.0
libtpu: 0.0.40
codegen_flags: <defaults>
</compile_context>

<pallas_src>
import math

import jax
import jax.numpy as jnp
from jax.experimental import pallas as pl
from jax.experimental.pallas import tpu as pltpu


def sem_encoder_kernel(adj_ref, x_ref, mean_ref, logits_ref):
    # adj_ref  : (d, d)   -- I - sinh(3A)^T, grid-invariant (DMA'd once)
    # x_ref    : (d, TN)  -- lane tile of the folded (d, B*n) inputs
    # mean_ref : (d, TN)  -- meanF tiled to tile width, grid-invariant
    xc = x_ref[...] - mean_ref[...]                      # VPU, hidden by DMA
    logits_ref[...] = jnp.dot(adj_ref[...], xc,          # one wide MXU matmul
                              preferred_element_type=jnp.float32)


def _tile_width(n, total, target=8192):
    """Lane-tile width.

    Always a multiple of 128 (unmasked, lane-dense stores).  For multi-tile
    grids it is also a multiple of n (so batch / meanF boundaries line up with
    tile boundaries), capped at `target` and at total//2 so the grid keeps at
    least 2 steps (megacore sharding on v7x).
    """
    unit = n * (128 // math.gcd(n, 128))          # lcm(n, 128)
    if total <= unit:
        # single block: pad its width up to a multiple of 128
        return ((total + 127) // 128) * 128
    tn = unit
    cap = min(target, total // 2)
    while tn * 2 <= cap:
        tn *= 2
    return tn


def sem_encoder_forward(inputs, adj_A):
    """JAX/Pallas equivalent of SEMEncoder.forward."""
    B, d, n = inputs.shape
    inputs = inputs.astype(jnp.float32)
    adj_A = adj_A.astype(jnp.float32)

    # --- glue: tiny (d,d)-sized preprocessing -------------------------------
    adj_A1 = jnp.sinh(3.0 * adj_A)
    eye = jnp.eye(d, dtype=jnp.float32)
    adj_norm = eye - adj_A1.T                     # preprocess_adj_new
    # meanF = inv(adj_norm) @ mean(adj_norm @ inputs, 0) == mean(inputs, 0):
    # the batch mean commutes with the (linear) left matmul and inv(A)@A = I,
    # so the 16x16 inverse and both glue matmuls drop out entirely.
    meanF = jnp.mean(inputs, axis=0)              # (d, n)

    # x_centered stays in the native (B, d, n) layout: one fused XLA
    # broadcast-subtract, no extra kernel writeback / transpose pass.
    x_centered = inputs - meanF[None]

    # --- fold batch into the lane axis: (B, d, n) -> (d, B*n) ---------------
    Bn = B * n
    x2d = jnp.transpose(inputs, (1, 0, 2)).reshape(d, Bn)
    tn = _tile_width(n, Bn)
    Bn_pad = pl.cdiv(Bn, tn) * tn
    if Bn_pad != Bn:
        x2d = jnp.pad(x2d, ((0, 0), (0, Bn_pad - Bn)))
    # meanF tiled to one lane-tile width (grid-invariant, DMA'd once).
    mean_tile = jnp.tile(meanF, (1, pl.cdiv(tn, n)))[:, :tn]

    grid = (Bn_pad // tn,)
    cost = pl.CostEstimate(
        flops=2 * d * d * Bn_pad,
        transcendentals=0,
        bytes_accessed=4 * (d * d + d * tn + 2 * d * Bn_pad),
    )

    logits2d = pl.pallas_call(
        sem_encoder_kernel,
        out_shape=jax.ShapeDtypeStruct((d, Bn_pad), jnp.float32),
        grid_spec=pltpu.PrefetchScalarGridSpec(
            num_scalar_prefetch=0,
            grid=grid,
            in_specs=[
                # (d,d) matrix: constant index_map -> fetched once, resident
                pl.BlockSpec((d, d), lambda i: (0, 0)),
                # lane tile of the folded inputs (the only streamed operand)
                pl.BlockSpec((d, tn), lambda i: (0, i)),
                # tiled meanF: constant index_map -> fetched once, resident
                pl.BlockSpec((d, tn), lambda i: (0, 0)),
            ],
            out_specs=pl.BlockSpec((d, tn), lambda i: (0, i)),
        ),
        compiler_params=pltpu.CompilerParams(
            dimension_semantics=("parallel",)),
        cost_estimate=cost,
    )(adj_norm, x2d, mean_tile)

    # Only logits needs unfolding back to (B, d, n); pad tail is sliced off.
    logits = jnp.transpose(logits2d[:, :Bn].reshape(d, B, n), (1, 0, 2))

    # TODO(synk): PyTorch also returns self.z / self.z_positive, which are
    #             never defined on SEMEncoder (would raise AttributeError);
    #             omitted here.
    return x_centered, logits, adj_A1, adj_norm, adj_A


if __name__ == "__main__":
    key = jax.random.PRNGKey(0)
    k1, k2 = jax.random.split(key)

    batch = 250    # exercises lane tiling (tn=256 here) and padding (-> 1024)
    d = 16         # data_variable_size
    n_in = 4       # per-node feature dim

    adj_A = 0.1 * jax.random.normal(k1, (d, d), dtype=jnp.float32)
    inputs = jax.random.normal(k2, (batch, d, n_in), dtype=jnp.float32)

    x_centered, logits, adj_A1, adj_norm, adj_param = sem_encoder_forward(
        inputs, adj_A)
    jax.block_until_ready((x_centered, logits, adj_A1, adj_norm, adj_param))

    # Plain-JAX reference (follows the PyTorch forward literally, incl. inv).
    adj_A1_r = jnp.sinh(3.0 * adj_A)
    adj_norm_r = jnp.eye(d, dtype=jnp.float32) - adj_A1_r.T
    adj_inv_r = jnp.linalg.inv(adj_norm_r)
    meanF_r = adj_inv_r @ jnp.mean(
        jnp.einsum('ij,bjk->bik', adj_norm_r, inputs), axis=0)
    xc_r = inputs - meanF_r
    logits_r = jnp.einsum('ij,bjk->bik', adj_norm_r, xc_r)

    assert jnp.allclose(x_centered, xc_r, atol=1e-4, rtol=1e-4)
    assert jnp.allclose(logits, logits_r, atol=1e-4, rtol=1e-4)
    assert jnp.allclose(adj_A1, adj_A1_r, atol=1e-6, rtol=1e-6)
    assert jnp.allclose(adj_norm, adj_norm_r, atol=1e-6, rtol=1e-6)
    assert jnp.allclose(adj_param, adj_A)

    print("KERNEL_OK")
</pallas_src>

<mosaic_0001>
module attributes {stable_mosaic.version = 11 : i64} {
  func.func @sem_encoder_kernel(%arg0: i32, %arg1: memref<16x16xf32, #tpu.memory_space<vmem>>, %arg2: memref<16x256xf32, #tpu.memory_space<vmem>>, %arg3: memref<16x256xf32, #tpu.memory_space<vmem>>, %arg4: memref<16x256xf32, #tpu.memory_space<vmem>>) attributes {dimension_semantics = [#tpu.dimension_semantics<parallel>], iteration_bounds = array<i64: 4>, scalar_prefetch = 0 : i64, scratch_operands = 0 : i64, tpu.core_type = #tpu.core_type<tc>, window_params = [{pipeline_mode = #tpu.pipeline_mode<synchronous>, transform_indices = @transform_0, window_bounds = array<i64: 16, 16>}, {transform_indices = @transform_1, window_bounds = array<i64: 16, 256>}, {pipeline_mode = #tpu.pipeline_mode<synchronous>, transform_indices = @transform_2, window_bounds = array<i64: 16, 256>}, {transform_indices = @transform_3, window_bounds = array<i64: 16, 256>}]} {
    %c0 = arith.constant 0 : index
    %c0_0 = arith.constant 0 : index
    %0 = vector.load %arg2[%c0, %c0_0] : memref<16x256xf32, #tpu.memory_space<vmem>>, vector<16x256xf32>
    %c0_1 = arith.constant 0 : index
    %c0_2 = arith.constant 0 : index
    %1 = vector.load %arg3[%c0_1, %c0_2] : memref<16x256xf32, #tpu.memory_space<vmem>>, vector<16x256xf32>
    %2 = arith.subf %0, %1 : vector<16x256xf32>
    %c0_3 = arith.constant 0 : index
    %c0_4 = arith.constant 0 : index
    %3 = vector.load %arg1[%c0_3, %c0_4] : memref<16x16xf32, #tpu.memory_space<vmem>>, vector<16x16xf32>
    %cst = arith.constant dense<0.000000e+00> : vector<16x256xf32>
    %4 = tpu.matmul %3, %2, %cst {dimension_numbers = #tpu.dot_dimension_numbers<[1], [0], [0], [1], [0, 0, 1, 1], [], []>} : vector<16x16xf32>, vector<16x256xf32>, vector<16x256xf32> -> vector<16x256xf32>
    %c0_5 = arith.constant 0 : index
    %c0_6 = arith.constant 0 : index
    %5 = vector.load %arg4[%c0_5, %c0_6] : memref<16x256xf32, #tpu.memory_space<vmem>>, vector<16x256xf32>
    tpu.vector_store %arg4[%c0_5, %c0_6], %4 {strides = array<i32>} : memref<16x256xf32, #tpu.memory_space<vmem>>, vector<16x256xf32>,
    return
  }
  func.func @transform_0(%arg0: i32) -> (i32, i32) {
    %c0_i32 = arith.constant 0 : i32
    %c0_i32_0 = arith.constant 0 : i32
    %c0_i32_1 = arith.constant 0 : i32
    return %c0_i32, %c0_i32_0 : i32, i32
  }
  func.func @transform_1(%arg0: i32) -> (i32, i32) {
    %c0_i32 = arith.constant 0 : i32
    %c0_i32_0 = arith.constant 0 : i32
    return %c0_i32, %arg0 : i32, i32
  }
  func.func @transform_2(%arg0: i32) -> (i32, i32) {
    %c0_i32 = arith.constant 0 : i32
    %c0_i32_0 = arith.constant 0 : i32
    %c0_i32_1 = arith.constant 0 : i32
    return %c0_i32, %c0_i32_0 : i32, i32
  }
  func.func @transform_3(%arg0: i32) -> (i32, i32) {
    %c0_i32 = arith.constant 0 : i32
    %c0_i32_0 = arith.constant 0 : i32
    return %c0_i32, %arg0 : i32, i32
  }
}

</mosaic_0001>

<bundles_post_ra>
// kernel: tpu_custom_call.1
= control target key start
LH: loop header
LB: loop body
LE: loop exit
PB: predicated region body
PF: predicated region fallthrough
CT: control target
= control target key end

     0   :  { %s871_s0 = inlined_call_operand.hbm [shape: f32[16,16], index: 0, kind: input, shape index: {}]   ;;  %s872_s1 = inlined_call_operand.hbm [shape: f32[16,1024], index: 1, kind: input, shape index: {}]   ;;  %s873_s2 = inlined_call_operand.hbm [shape: f32[16,256], index: 2, kind: input, shape index: {}]   ;;  %s874_s3 = inlined_call_operand.hbm [shape: f32[16,1024], index: 3, kind: output, shape index: {}]  }
   0x1   :  { %877 = sst [smem:[#allocation14_spill]] %s871_s0 }
   0x2   :  { %878 = sst [smem:[#allocation15_spill]] %s873_s2 }
   0x3   :  { %8 = vsyncpa [#allocation3], 0 }
   0x4   :  { %9 = vsyncpa [#allocation6], 0 }
   0x5   :  { %11 = vsyncpa [#allocation6 + $0x1], 0 }
   0x6   :  { %12 = vsyncpa [#allocation4], 0 }
   0x7   :  { %14 = vsyncpa [#allocation4 + $0x1], 0  ;;  %s706_s12 = smov 0   ;;  %s708_s13 = smov 0  }
   0x8   :  { %s710_s14 = smov 0   ;;  %s712_s15 = smov 0  }
   0x9 LB: > { %s727_s16 = sadd.s32 4294967295, %s674_s15   ;;  %s407_s17 = sadd.s32 4294967294, %s674_s15   ;;  %s674_s15 = sphi %s712_s15, %s895_s15   ;;  %s670_s14 = sphi %s710_s14, %s894_s14   ;;  %s666_s13 = sphi %s708_s13, %s893_s13   ;;  %s662_s12 = sphi %s706_s12, %s892_s12  }
   0xa   : > { %s731_s18 = sadd.s32 1, %s674_s15   ;;  %s48_s19 = sadd.s32 1, %s670_s14 }
   0xb   : > { %s45_s20 = ssub.s32 %s674_s15, %s731_s18  ;;  %p55_p0 = scmp.ne.s32.totalorder %s670_s14, %s666_s13 }
   0xc   : > { %p46_p1 = scmp.eq.s32.totalorder %s45_s20, 0  ;;  %p56_p2 = scmp.eq.s32.totalorder %s674_s15, 0 }
   0xd   : > { %p61_p3 = scmp.ne.s32.totalorder %s666_s13, %s662_s12  ;;  %p62_p4 = scmp.eq.s32.totalorder %s727_s16, 0 }
   0xe   : > { %s743_s21 = scalar_select %p46_p1, %s670_s14, %s48_s19  }
   0xf   : > { %p745_p5 = por %p56_p2, %p55_p0  ;;  %p751_p6 = por %p62_p4, %p61_p3 }
  0x10   : > { %879 = sst [smem:[#allocation13_spill]] %s743_s21  ;;  %p106_p7 = scmp.eq.s32.totalorder %s727_s16, 3 }
  0x11   : > { %p112_p8 = scmp.eq.s32.totalorder %s407_s17, 3  ;;  %p408_p9 = scmp.ge.s32.totalorder %s674_s15, 1 }
  0x12   : > { %p119_p10 = scmp.lt.s32.totalorder %s674_s15, 5  ;;  %p758_p11 = por %p106_p7, %p55_p0 }
  0x13   : > { %p762_p12 = por %p112_p8, %p61_p3  ;;  %s885_s2 = sld [smem:[#allocation15_spill]] }
  0x14   : > { %p766_p13 = pnand %p408_p9, %p119_p10  ;;  %s676_s30 = smov [#allocation7]  }
  0x15   : > { %s146_s4 = sshll.u32 %s676_s30, 4  ;;  %p464_p2 = scmp.lt.s32.totalorder %s674_s15, 4  ;;  %s147_s4 = int_to_ptr.vmem [resolvable:$true] %s146_s4 }
  0x16   : > { %p447_p1 = pneg %p766_p13  ;;  %s875_s6 = smov 256  }
  0x17   : > { %s876_s7 = smov 16   ;;  %p789_p3 = pnand %p464_p2, %p745_p5 }
  0x18   : > { %p777_p0 = pnand %p447_p1, %p62_p4  ;;  %s888_s0 = sld [smem:[#allocation14_spill]] }
  0x19   : > { %s144_s29 = sshll.u32 %s885_s2, 4  ;;  %s679_s17 = smov [#allocation2]   ;;  %s145_s29 = int_to_ptr.hbm [resolvable:$true] %s144_s29 }
  0x1a   : > { %453 = dma.hbm_to_vmem [thread:$0]  (!%p777_p0), %s145_s29, 512, %s147_s4, [#allocation6], %s875_s6, %s875_s6, %s876_s7  }
  0x1b   : > { %s132_s19 = sshll.u32 %s679_s17, 4  ;;  %s160_s20 = sand.u32 1, %s674_s15   ;;  %s133_s19 = int_to_ptr.vmem [resolvable:$true] %s132_s19 }
  0x1c   : > { %s680_s27 = smov 128   ;;  %s681_s28 = smov 8  }
  0x1d   : > { %s162_s29 = sand.u32 1, %s670_s14   ;;  %s429_s30 = sshll.u32 %s674_s15, 4 }
  0x1e   : > { %s130_s11 = sshll.u32 %s888_s0, 4  ;;  %s412_s22 = sshll.u32 %s162_s29, 5  ;;  %s131_s11 = int_to_ptr.hbm [resolvable:$true] %s130_s11 }
  0x1f   : > { %450 = dma.hbm_to_vmem [thread:$0]  (!%p777_p0), %s131_s11, 256, %s133_s19, [#allocation3], %s680_s27, %s680_s27, %s681_s28  }
  0x20   : > { %s169_s7 = scalar_lea.hbm %s872_s1, %s429_s30  ;;  %s164_s9 = scalar_lea.vmem [#allocation5], %s412_s22 }
  0x21   : > { %s170_s2 = sshll.u32 %s169_s7, 4  ;;  %s172_s10 = sshll.u32 %s164_s9, 4  ;;  %s171_s2 = int_to_ptr.hbm [resolvable:$true] %s170_s2  ;;  %s173_s10 = int_to_ptr.vmem [resolvable:$true] %s172_s10 }
  0x22   : > { %s161_s17 = scalar_lea.sflag [#allocation6], %s160_s20  ;;  %s570_s0 = sshra.s32 %s171_s2, 4  ;;  %s571_s0 = int_to_ptr.hbm [resolvable:$true] %s570_s0 }
  0x23   : > { %s572_s21 = scalar_lea.hbm %s571_s0, 32  ;;  %p574_p7 = pneg %p789_p3 }
  0x24   : > { %p573_p5 = scmp.ne.s32.totalorder %s571_s0, %s572_s21  ;;  %s577_s19 = scalar_lea.hbm %s872_s1, 128 }
  0x25   : > { %p578_p10 = scmp.lt.s32.totalorder %s571_s0, %s872_s1  ;;  %p579_p1 = scmp.lt.s32.totalorder %s577_s19, %s572_s21 }
  0x26   : > { %p575_p8 = pnand %p574_p7, %p573_p5 }
  0x27   : > { %p580_p0 = por %p579_p1, %p578_p10 }
  0x28   : > { %p576_p9 = pneg %p575_p8 }
  0x2a   : > { %p581_p2 = pnand %p580_p0, %p576_p9 }
  0x2c   : > { %584 = shalt.err (!%p581_p2)
}
  0x2d   : > { %s682_s7 = smov 1024   ;;  %s889_s20 = smov 16  }
  0x2e   : > { %s890_s28 = smov 256   ;;  %184 = sbr.rel (%p766_p13) target bundleno = 203 (0xcb), region = 32 }
  0x2f   : > { %457 = dma.hbm_to_vmem [thread:$0]  (!%p789_p3), %s171_s2, 512, %s173_s10, %s161_s17, %s682_s7, %s890_s28, %s889_s20  }
  0x33   : > { %645 = dma.done.wait (%p62_p4), [#allocation3], 256  }
  0x34   : > { %647 = vsyncadd (%p62_p4), [#allocation3], 4294967040  ;;  %s191_s0 = sand.u32 1, %s727_s16   ;;  %s193_s21 = sand.u32 1, %s666_s13  }
  0x35   : > { %s826_s8 = sshll.u32 %s193_s21, 5  ;;  %s192_s2 = scalar_lea.sflag [#allocation6], %s191_s0 }
  0x36   : > { %s195_s29 = scalar_lea.vmem [#allocation5], %s826_s8 }
  0x37   : > { %649 = dma.done.wait (%p751_p6), %s192_s2, 512  }
  0x38   : > { %651 = vsyncadd (%p751_p6), %s192_s2, 4294966784 }
  0x39   : > { %653 = dma.done.wait (%p62_p4), [#allocation6], 512  }
  0x3a   : > { %655 = vsyncadd (%p62_p4), [#allocation6], 4294966784  ;;  %v228_v0 = vld [vmem:[%s195_s29 + $0x10] sm:$0xff]  ;;  %v229_v2 = vld [vmem:[%s195_s29 + $0x18] sm:$0xff]  ;;  %vm240_vm0 = vcmask 130048   ;;  %s430_s23 = sshll.u32 %s727_s16, 4 }
  0x3b   : > { %v232_v1 = vld [vmem:[#allocation7 + $0x10] sm:$0xff]  ;;  %v233_v4 = vld [vmem:[#allocation7 + $0x18] sm:$0xff]  ;;  %v226_v5 = vld [vmem:[%s195_s29] sm:$0xff]  ;;  %s309_s30 = scalar_lea.hbm %s874_s3, %s430_s23  ;;  %s223_s4 = scalar_lea.vmem [#allocation8], %s826_s8 }
  0x3c   : > { %v236_v3 = vsub.f32 %v228_v0, %v232_v1  ;;  %v230_v6 = vld [vmem:[#allocation7] sm:$0xff]  ;;  %v237_v7 = vsub.f32 %v229_v2, %v233_v4  ;;  %v227_v9 = vld [vmem:[%s195_s29 + $0x8] sm:$0xff]  ;;  %v239_v12 = vld [vmem:[#allocation2 + $0x8] sm:$0xff]  ;;  %s310_s9 = sshll.u32 %s223_s4, 4  ;;  %s312_s10 = sshll.u32 %s309_s30, 4  ;;  %s311_s9 = int_to_ptr.vmem [resolvable:$true] %s310_s9  ;;  %s313_s10 = int_to_ptr.hbm [resolvable:$true] %s312_s10 }
  0x3d   : > { %v234_v8 = vsub.f32 %v226_v5, %v230_v6  ;;  %v231_v10 = vld [vmem:[#allocation7 + $0x8] sm:$0xff]  ;;  %v238_v13 = vld [vmem:[#allocation2] sm:$0xff]  ;;  %s298_s16 = scalar_lea.sflag [#allocation4], %s193_s21  ;;  %s614_s17 = sshra.s32 %s313_s10, 4  ;;  %s615_s17 = int_to_ptr.hbm [resolvable:$true] %s614_s17 }
  0x3e   : > { %431 = vmatpush.msra.mxu2 %v236_v3  ;;  %v235_v11 = vsub.f32 %v227_v9, %v231_v10  ;;  %261 = vmatpush.msra.mxu0 %v236_v3  ;;  %s616_s5 = scalar_lea.hbm %s615_s17, 32  ;;  %s620_s6 = scalar_lea.hbm %s874_s3, 128 }
  0x3f   : > { %433 = vmatpush.msra.mxu3 %v237_v7  ;;  %284 = vmatpush.msra.mxu1 %v237_v7  ;;  %p617_p4 = scmp.ne.s32.totalorder %s615_s17, %s616_s5  ;;  %p621_p3 = scmp.lt.s32.totalorder %s615_s17, %s874_s3 }
  0x40   : > { %432 = vmatpush.msra.mxu2 %v234_v8  ;;  %262 = vmatpush.msra.mxu0 %v234_v8  ;;  %p622_p5 = scmp.lt.s32.totalorder %s620_s6, %s616_s5 }
  0x41   : > { %434 = vmatpush.msra.mxu3 %v235_v11  ;;  %421 = vmatmul.msk.f32.vlgmr.msra.gmra.mxu2 %vm240_vm0, %v239_v12  ;;  %p618_p6 = pnand %p617_p4, %p758_p11 }
  0x42   : > { %423 = vmatmul.msk.f32.vlgmr.msra.gmra.mxu3 %vm240_vm0, %v239_v12  ;;  %285 = vmatpush.msra.mxu1 %v235_v11  ;;  %p623_p7 = por %p622_p5, %p621_p3 }
  0x43   : > { %420 = vmatmul.msk.f32.vlgmr.msra.gmra.mxu0 %vm240_vm0, %v238_v13  ;;  %422 = vmatmul.msk.f32.vlgmr.msra.gmra.mxu1 %vm240_vm0, %v238_v13  ;;  %p619_p13 = pneg %p618_p6 }
  0x45   : > { %p624_p8 = pnand %p623_p7, %p619_p13 }
  0xc0   : > { %v264_v14 = vpop.f32.mrf.mxu0  ;;  %v287_v15 = vpop.f32.mrf.mxu1 }
  0xc1   : > { %293 = vst [vmem:[%s223_s4] sm:$0xff] %v264_v14 }
  0xc2   : > { %294 = vst [vmem:[%s223_s4 + $0x8] sm:$0xff] %v287_v15 }
  0xc4   : > { %v267_v16 = vpop.f32.mrf.mxu2 }
  0xc5   : > { %295 = vst [vmem:[%s223_s4 + $0x10] sm:$0xff] %v267_v16  ;;  %v290_v17 = vpop.f32.mrf.mxu3 }
  0xc6   : > { %296 = vst [vmem:[%s223_s4 + $0x18] sm:$0xff] %v290_v17 }
  0xc7   : > { %627 = shalt.err (!%p624_p8)
}
  0xc8   : > { %s683_s20 = smov 256   ;;  %s684_s28 = smov 1024  }
  0xc9   : > { %s685_s0 = smov 16  }
  0xca   : > { %445 = dma.vmem_to_hbm [thread:$0]  (%p758_p11), %s311_s9, 512, %s313_s10, %s298_s16, %s683_s20, %s684_s28, %s685_s0  }
  0xcb PF: > { %p467_p9 = scmp.ge.s32.totalorder %s674_s15, 2  ;;  %s327_s21 = sand.u32 1, %s662_s12  }
  0xcc   : > { %s328_s8 = scalar_lea.sflag [#allocation4], %s327_s21 }
  0xcd   : > { %p459_p10 = pnand %p467_p9, %p762_p12 }
  0xcf   : > { %p460_p1 = pneg %p459_p10 }
  0xd1   : > { %657 = dma.done.wait (%p460_p1), %s328_s8, 512  }
  0xd2   : > { %659 = vsyncadd (%p460_p1), %s328_s8, 4294966784  ;;  %s891_s2 = sld [smem:[#allocation13_spill]]  ;;  %p17_p0 = scmp.ge.s32.totalorder %s731_s18, 6  }
  0xd3   : > { %s892_s12 = smov %s666_s13  ;;  %s893_s13 = smov %s670_s14 }
  0xd4   : > { %s895_s15 = smov %s731_s18  ;;  %19 = sbr.rel (!%p17_p0) target bundleno = 9 (0x9), region = 86 }
  0xd8   : > { %s894_s14 = smov %s891_s2 }
  0xd9   :  { %334 = vsyncpa [#allocation3], 1 }
  0xda   :  { %336 = vsyncpa [#allocation3 + $0x1], 1 }
  0xdb   :  { %337 = vsyncpa [#allocation6], 1 }
  0xdc   :  { %339 = vsyncpa [#allocation6 + $0x1], 1 }
  0xdd   :  { %340 = vsyncpa [#allocation4], 1 }
  0xde   :  { %342 = vsyncpa [#allocation4 + $0x1], 1 }

</bundles_post_ra>
